<compile_context>
chip_gen: v7x
topology: tpu7x:2x2x1
jax: 0.10.0
libtpu: 0.0.40
codegen_flags: <defaults>
</compile_context>

<pallas_src>
import jax
import jax.numpy as jnp
from jax import lax
from jax.experimental import pallas as pl
from jax.experimental.pallas import tpu as pltpu


def _fused_kernel(w_ref, p_ref, b_ref, o_ref):
    # w_ref: (C2, K2)      bf16 fused weight   (C2 = Cout*L_out, K2 = OW*Cin*KH*KW)
    # p_ref: (K2, m_tile)  bf16 patch columns  (lane axis = m_tile, lane-dense)
    # b_ref: (C2, 1)       f32  fused bias
    # o_ref: (C2, m_tile)  f32  output columns (lane-dense, unmasked stores)
    acc = jnp.dot(w_ref[...], p_ref[...], preferred_element_type=jnp.float32)
    o_ref[...] = acc + b_ref[...]


def _pick_m_tile(m, target=4096):
    """Lane-dense (multiple-of-128) tile that divides M; keep grid >= 2 when
    possible so the "parallel" axis can shard across v7x's two TensorCores."""
    best = None
    t = 128
    while t <= min(target, m):
        if m % t == 0:
            best = t
        t += 128
    if best is None:
        return m  # tiny / ragged M: single full-extent block
    if best == m and m >= 256 and (m // 2) % 128 == 0:
        best = m // 2
    return best


def fused_conv_bn_linear(x, conv_w, conv_b, bn_params, lin_w, lin_b, *, eps=1e-5):
    """x: (N, Cin, H, W) NCHW. Returns (N, Cout, OH, L_out) like the torch model."""
    N, Cin, H, W = x.shape
    Cout, _, KH, KW = conv_w.shape
    OH, OW = H // KH, W // KW
    assert OW == lin_w.shape[1], "Linear(2,2) acts on the conv-output width dim"
    L_out = lin_w.shape[0]

    # ---- fold the 3 eval-mode BatchNorms + conv bias into a per-channel affine
    scale = jnp.ones((Cout,), jnp.float32)
    shift = jnp.zeros((Cout,), jnp.float32)
    for g, b, m, v in bn_params:
        s_i = g / jnp.sqrt(v + eps)
        t_i = b - s_i * m
        scale = s_i * scale
        shift = s_i * shift + t_i
    ch_bias = scale * conv_b + shift                              # (Cout,)

    # ---- fold conv weight + BN scale + Linear into one (transposed) matmul weight/bias
    K = Cin * KH * KW
    K2 = OW * K
    C2 = Cout * L_out
    w_flat = conv_w.astype(jnp.float32).reshape(Cout, K)          # (Cout, K)
    # W_T[(cout,ow_out), (ow,k)] = lin_w[ow_out,ow] * scale[cout] * w_flat[cout,k]
    w_t = jnp.einsum("yw,c,ck->cywk", lin_w, scale, w_flat)
    w_t = w_t.reshape(C2, K2).astype(jnp.bfloat16)                # (C2, K2)
    # B_T[(cout,ow_out)] = ch_bias[cout]*sum_ow lin_w[ow_out,ow] + lin_b[ow_out]
    b_t = ch_bias[:, None] * jnp.sum(lin_w, axis=1)[None, :] + lin_b[None, :]
    b_t = b_t.reshape(C2, 1).astype(jnp.float32)                  # (C2, 1)

    # ---- transposed non-overlapping 4x4 patch extraction: (K2, M), M on lanes.
    # Cast to bf16 BEFORE the layout transform so the transposed copy is
    # written in bf16 (halves the wrapper-side HBM traffic); no padding.
    xb = x.astype(jnp.bfloat16)
    p = xb.reshape(N, Cin, OH, KH, OW, KW).transpose(4, 1, 3, 5, 0, 2)
    p_t = p.reshape(K2, N * OH)                                   # (K2, M) bf16
    M = N * OH

    m_tile = _pick_m_tile(M)
    grid = (pl.cdiv(M, m_tile),)

    out_t = pl.pallas_call(
        _fused_kernel,
        out_shape=jax.ShapeDtypeStruct((C2, M), jnp.float32),
        grid_spec=pltpu.PrefetchScalarGridSpec(
            num_scalar_prefetch=0,
            grid=grid,
            in_specs=[
                pl.BlockSpec((C2, K2), lambda i: (0, 0)),         # fused weight
                pl.BlockSpec((K2, m_tile), lambda i: (0, i)),     # patch columns
                pl.BlockSpec((C2, 1), lambda i: (0, 0)),          # fused bias
            ],
            out_specs=pl.BlockSpec((C2, m_tile), lambda i: (0, i)),
        ),
        compiler_params=pltpu.CompilerParams(
            dimension_semantics=("parallel",),
        ),
    )(w_t, p_t, b_t)

    # ---- back to NCHW-ish: rows were (cout, ow_out); columns were (n, oh)
    out = out_t.reshape(Cout, L_out, N, OH).transpose(2, 0, 3, 1)
    return out


def reference(x, conv_w, conv_b, bn_params, lin_w, lin_b, *, eps=1e-5):
    """Pure-JAX reference of the PyTorch forward (eval-mode BN)."""
    y = lax.conv_general_dilated(
        x, conv_w, window_strides=(4, 4), padding="VALID",
        dimension_numbers=("NCHW", "OIHW", "NCHW"))
    y = y + conv_b[None, :, None, None]
    for g, b, m, v in bn_params:
        y = (g[None, :, None, None] * (y - m[None, :, None, None])
             / jnp.sqrt(v[None, :, None, None] + eps) + b[None, :, None, None])
    return jnp.einsum("nchw,ow->ncho", y, lin_w) + lin_b


if __name__ == "__main__":
    key = jax.random.PRNGKey(0)
    ks = jax.random.split(key, 18)

    # NOTE: the module's Linear(2,2) acts on the conv-output width, so the
    # input width must be 2*KW = 8 for the forward to be valid.
    N, Cin, H, W = 8, 2, 256, 8
    Cout, KH, KW = 2, 4, 4

    x = jax.random.normal(ks[0], (N, Cin, H, W), jnp.float32)

    # Conv2d(2, 2, kernel_size=(4, 4), stride=(4, 4)) params (PyTorch-style init)
    bound = 1.0 / (Cin * KH * KW) ** 0.5
    conv_w = jax.random.uniform(ks[1], (Cout, Cin, KH, KW), jnp.float32, -bound, bound)
    conv_b = jax.random.uniform(ks[2], (Cout,), jnp.float32, -bound, bound)

    # 3x BatchNorm2d(2) eval-mode params (non-trivial so the fold is exercised)
    bn_params = []
    for i in range(3):
        g = jax.random.uniform(ks[3 + i], (Cout,), jnp.float32, 0.8, 1.2)
        b = 0.3 * jax.random.normal(ks[6 + i], (Cout,), jnp.float32)
        m = 0.3 * jax.random.normal(ks[9 + i], (Cout,), jnp.float32)
        v = jax.random.uniform(ks[12 + i], (Cout,), jnp.float32, 0.8, 1.2)
        bn_params.append((g, b, m, v))

    # Linear(2, 2)
    lbound = 1.0 / 2 ** 0.5
    lin_w = jax.random.uniform(ks[15], (2, 2), jnp.float32, -lbound, lbound)
    lin_b = jax.random.uniform(ks[16], (2,), jnp.float32, -lbound, lbound)

    out = fused_conv_bn_linear(x, conv_w, conv_b, bn_params, lin_w, lin_b)
    out = jax.block_until_ready(out)

    ref = reference(x, conv_w, conv_b, bn_params, lin_w, lin_b)
    assert out.shape == (N, Cout, H // KH, 2), out.shape
    max_err = float(jnp.max(jnp.abs(out - ref)))
    assert max_err < 5e-2, f"max abs error {max_err}"
    print("KERNEL_OK")
</pallas_src>

<mosaic_0001>
module attributes {stable_mosaic.version = 11 : i64} {
  func.func @_fused_kernel(%arg0: i32, %arg1: memref<4x64xbf16, #tpu.memory_space<vmem>>, %arg2: memref<64x256xbf16, #tpu.memory_space<vmem>>, %arg3: memref<4x1xf32, #tpu.memory_space<vmem>>, %arg4: memref<4x256xf32, #tpu.memory_space<vmem>>) attributes {dimension_semantics = [#tpu.dimension_semantics<parallel>], iteration_bounds = array<i64: 2>, scalar_prefetch = 0 : i64, scratch_operands = 0 : i64, tpu.core_type = #tpu.core_type<tc>, window_params = [{pipeline_mode = #tpu.pipeline_mode<synchronous>, transform_indices = @transform_0, window_bounds = array<i64: 4, 64>}, {transform_indices = @transform_1, window_bounds = array<i64: 64, 256>}, {pipeline_mode = #tpu.pipeline_mode<synchronous>, transform_indices = @transform_2, window_bounds = array<i64: 4, 1>}, {transform_indices = @transform_3, window_bounds = array<i64: 4, 256>}]} {
    %c0 = arith.constant 0 : index
    %c0_0 = arith.constant 0 : index
    %0 = vector.load %arg1[%c0, %c0_0] : memref<4x64xbf16, #tpu.memory_space<vmem>>, vector<4x64xbf16>
    %c0_1 = arith.constant 0 : index
    %c0_2 = arith.constant 0 : index
    %1 = vector.load %arg2[%c0_1, %c0_2] : memref<64x256xbf16, #tpu.memory_space<vmem>>, vector<64x256xbf16>
    %cst = arith.constant dense<0.000000e+00> : vector<4x256xf32>
    %2 = tpu.matmul %0, %1, %cst {dimension_numbers = #tpu.dot_dimension_numbers<[1], [0], [0], [1], [0, 0, 1, 1], [], []>} : vector<4x64xbf16>, vector<64x256xbf16>, vector<4x256xf32> -> vector<4x256xf32>
    %c0_3 = arith.constant 0 : index
    %c0_4 = arith.constant 0 : index
    %3 = vector.load %arg3[%c0_3, %c0_4] : memref<4x1xf32, #tpu.memory_space<vmem>>, vector<4x1xf32>
    %4 = vector.broadcast %3 : vector<4x1xf32> to vector<4x256xf32>
    %5 = arith.addf %2, %4 : vector<4x256xf32>
    %c0_5 = arith.constant 0 : index
    %c0_6 = arith.constant 0 : index
    %6 = vector.load %arg4[%c0_5, %c0_6] : memref<4x256xf32, #tpu.memory_space<vmem>>, vector<4x256xf32>
    tpu.vector_store %arg4[%c0_5, %c0_6], %5 {strides = array<i32>} : memref<4x256xf32, #tpu.memory_space<vmem>>, vector<4x256xf32>,
    return
  }
  func.func @transform_0(%arg0: i32) -> (i32, i32) {
    %c0_i32 = arith.constant 0 : i32
    %c0_i32_0 = arith.constant 0 : i32
    %c0_i32_1 = arith.constant 0 : i32
    return %c0_i32, %c0_i32_0 : i32, i32
  }
  func.func @transform_1(%arg0: i32) -> (i32, i32) {
    %c0_i32 = arith.constant 0 : i32
    %c0_i32_0 = arith.constant 0 : i32
    return %c0_i32, %arg0 : i32, i32
  }
  func.func @transform_2(%arg0: i32) -> (i32, i32) {
    %c0_i32 = arith.constant 0 : i32
    %c0_i32_0 = arith.constant 0 : i32
    %c0_i32_1 = arith.constant 0 : i32
    return %c0_i32, %c0_i32_0 : i32, i32
  }
  func.func @transform_3(%arg0: i32) -> (i32, i32) {
    %c0_i32 = arith.constant 0 : i32
    %c0_i32_0 = arith.constant 0 : i32
    return %c0_i32, %arg0 : i32, i32
  }
}

</mosaic_0001>

<bundles_post_ra>
// kernel: tpu_custom_call.1
= control target key start
LH: loop header
LB: loop body
LE: loop exit
PB: predicated region body
PF: predicated region fallthrough
CT: control target
= control target key end

     0   :  { %8 = vsyncpa [#allocation3], 0  ;;  %s763_s0 = inlined_call_operand.vmem [shape: bf16[4,64], index: 0, kind: input, shape index: {}]   ;;  %s764_s1 = inlined_call_operand.hbm [shape: bf16[64,512], index: 1, kind: input, shape index: {}]   ;;  %s765_s2 = inlined_call_operand.vmem [shape: f32[4,1], index: 2, kind: input, shape index: {}]   ;;  %s766_s3 = inlined_call_operand.hbm [shape: f32[4,512], index: 3, kind: output, shape index: {}]  }
   0x1   :  { %10 = vsyncpa [#allocation3 + $0x1], 0 }
   0x2   :  { %11 = vsyncpa [#allocation4], 0 }
   0x3   :  { %13 = vsyncpa [#allocation4 + $0x1], 0  ;;  %s594_s12 = smov 0   ;;  %s596_s13 = smov 0  }
   0x4   :  { %s598_s14 = smov 0   ;;  %s600_s15 = smov 0  }
   0x5 LB: > { %s615_s16 = sadd.s32 4294967295, %s566_s15   ;;  %s382_s17 = sadd.s32 4294967294, %s566_s15   ;;  %s566_s15 = sphi %s600_s15, %s780_s15   ;;  %s562_s14 = sphi %s598_s14, %s779_s14   ;;  %s558_s13 = sphi %s596_s13, %s778_s13   ;;  %s554_s12 = sphi %s594_s12, %s777_s12  }
   0x6   : > { %s619_s18 = sadd.s32 1, %s566_s15   ;;  %s47_s19 = sadd.s32 1, %s562_s14 }
   0x7   : > { %s44_s20 = ssub.s32 %s566_s15, %s619_s18  ;;  %p54_p0 = scmp.ne.s32.totalorder %s562_s14, %s558_s13 }
   0x8   : > { %p45_p1 = scmp.eq.s32.totalorder %s44_s20, 0  ;;  %p55_p2 = scmp.eq.s32.totalorder %s566_s15, 0 }
   0x9   : > { %p60_p3 = scmp.ne.s32.totalorder %s558_s13, %s554_s12  ;;  %p61_p4 = scmp.eq.s32.totalorder %s615_s16, 0 }
   0xa   : > { %s631_s21 = scalar_select %p45_p1, %s562_s14, %s47_s19  }
   0xb   : > { %p633_p5 = por %p55_p2, %p54_p0  ;;  %p637_p6 = por %p61_p4, %p60_p3 }
   0xc   : > { %p105_p7 = scmp.eq.s32.totalorder %s615_s16, 1  ;;  %p111_p8 = scmp.eq.s32.totalorder %s382_s17, 1 }
   0xd   : > { %p419_p10 = scmp.lt.s32.totalorder %s566_s15, 2  ;;  %s137_s26 = sand.u32 1, %s562_s14  }
   0xe   : > { %p644_p11 = por %p105_p7, %p54_p0  ;;  %p648_p12 = por %p111_p8, %p60_p3 }
   0xf   : > { %s405_s27 = sshll.u32 %s566_s15, 7  ;;  %s385_s28 = sshll.u32 %s137_s26, 6 }
  0x10   : > { %s770_s24 = scalar_select %p644_p11, 1, 0 }
  0x11   : > { %s771_s25 = scalar_select %p648_p12, 1, 0 }
  0x12   : > { %s657_s4 = scalar_lea.hbm %s764_s1, %s405_s27  ;;  %s141_s5 = scalar_lea.vmem [#allocation2], %s385_s28 }
  0x13   : > { %s148_s6 = sshll.u32 %s141_s5, 4  ;;  %p661_p13 = pnand %p419_p10, %p633_p5  ;;  %s665_s6 = int_to_ptr.vmem [resolvable:$true] %s148_s6 }
  0x14   : > { %s668_s8 = scalar_lea.sflag [#allocation3], %s137_s26  ;;  %s470_s9 = scalar_lea.hbm %s657_s4, 1024 }
  0x15   : > { %p471_p1 = scmp.ne.s32.totalorder %s657_s4, %s470_s9  ;;  %p472_p2 = pneg %p661_p13 }
  0x16   : > { %s475_s17 = scalar_lea.hbm %s764_s1, 2048  ;;  %p476_p5 = scmp.lt.u32.totalorder %s657_s4, %s764_s1 }
  0x17   : > { %p473_p3 = pnand %p472_p2, %p471_p1  ;;  %p477_p7 = scmp.lt.u32.totalorder %s475_s17, %s470_s9 }
  0x18   : > { %p479_p10 = scmp.lt.u32.totalorder %s470_s9, %s657_s4 }
  0x19   : > { %p474_p4 = pneg %p473_p3  ;;  %p478_p8 = por %p477_p7, %p476_p5 }
  0x1b   : > { %p480_p9 = por %p479_p10, %p478_p8 }
  0x1d   : > { %p481_p0 = pnand %p480_p9, %p474_p4 }
  0x1f   : > { %484 = shalt.err (!%p481_p0)
}
  0x20   : > { %s485_s22 = scalar_lea.vmem %s665_s6, 1024  ;;  %s568_s26 = smov [#allocation2]  }
  0x21   : > { %p486_p1 = scmp.ne.s32.totalorder %s665_s6, %s485_s22  ;;  %s490_s27 = sshll.u32 %s568_s26, 4  ;;  %s491_s27 = int_to_ptr.vmem [resolvable:$false] %s490_s27 }
  0x22   : > { %s492_s28 = scalar_lea.vmem %s491_s27, 2048  ;;  %p493_p11 = scmp.lt.s32.totalorder %s665_s6, %s491_s27 }
  0x23   : > { %p488_p3 = pnand %p486_p1, %p472_p2  ;;  %p494_p5 = scmp.lt.s32.totalorder %s492_s28, %s485_s22 }
  0x25   : > { %p489_p12 = pneg %p488_p3  ;;  %p495_p7 = por %p494_p5, %p493_p11 }
  0x27   : > { %p496_p8 = pnand %p495_p7, %p489_p12 }
  0x29   : > { %499 = shalt.err (!%p496_p8)
}
  0x2a   : > { %s569_s29 = smov 256   ;;  %s570_s30 = smov 128  }
  0x2b   : > { %s571_s5 = smov 8   ;;  %p156_p9 = scmp.lt.s32.totalorder %s566_s15, 3 }
  0x2c   : > { %414 = dma.hbm_to_vmem [thread:$0]  (!%p661_p13), %s657_s4, 1024, %s665_s6, %s668_s8, %s569_s29, %s570_s30, %s571_s5  }
  0x2d   : > { %p773_p0 = scmp.ge.s32.totalorder %s566_s15, 1 }
  0x2f   : > { %p157_p2 = pnand %p773_p0, %p156_p9 }
  0x30   : > { %s700_s9 = sand.u32 (!%p157_p2), 1, %s558_s13  }
  0x31   : > { %160 = sbr.rel (%p157_p2) target bundleno = 306 (0x132), region = 32  ;;  %s389_s10 = sshll.u32 (!%p157_p2), %s700_s9, 6 }
  0x32   : > { %s163_s11 = scalar_lea.sflag (!%p157_p2), [#allocation3], %s700_s9  ;;  %s166_s17 = scalar_lea.vmem (!%p157_p2), [#allocation2], %s389_s10 }
  0x38   : > { %545 = dma.done.wait (%p637_p6), %s163_s11, 1024  }
  0x39   : > { %547 = vsyncadd (%p637_p6), %s163_s11, 4294966272  ;;  %v572_v0 = vmov 0   ;;  %v458_v1 = vld [vmem:[%s166_s17 + $0x4] ss:$8 sps:$4 sm:$0xff]   ;;  %v460_v2 = vld [vmem:[%s166_s17] ss:$8 sps:$4 sm:$0xff]  }
  0x3a   : > { %283 = vmatprep.mubr.bf16.mxu0 %v572_v0  ;;  %457 = vset.pattern.permute.xlu0 %v572_v0  ;;  %v461_v3 = vld [vmem:[%s166_s17 + $0x14] ss:$8 sps:$4 sm:$0xff]   ;;  %v463_v4 = vld [vmem:[%s166_s17 + $0x10] ss:$8 sps:$4 sm:$0xff]   ;;  %v464_v5 = vld [vmem:[%s166_s17 + $0x24] ss:$8 sps:$4 sm:$0xff]  }
  0x3b   : > { %251 = vmatprep.subr.bf16.mxu0 %v458_v1  ;;  %v201_v6 = vld [vmem:[%s765_s2] sm:$0xf]  ;;  %v467_v8 = vld [vmem:[%s166_s17 + $0x34] ss:$8 sps:$4 sm:$0xff]   ;;  %v469_v9 = vld [vmem:[%s166_s17 + $0x30] ss:$8 sps:$4 sm:$0xff]  }
  0x3c   : > { %252 = vmatpush1.bf16.msra.mxu0 %v460_v2  ;;  %204 = vperm.xlu0 %457, %v201_v6   ;;  %v466_v7 = vld [vmem:[%s166_s17 + $0x20] ss:$8 sps:$4 sm:$0xff]   ;;  %vm247_vm0 = vcmask 523264   ;;  %s390_s8 = sshll.u32 %s700_s9, 3  ;;  %s406_s19 = sshll.u32 %s615_s16, 7 }
  0x3d   : > { %253 = vmatprep.subr.bf16.mxu0 %v461_v3  ;;  %v192_v10 = vld [vmem:[%s763_s0] sm:$0x3]  ;;  %s188_s20 = scalar_lea.vmem [#allocation5], %s390_s8  ;;  %s719_s28 = scalar_lea.hbm %s766_s3, %s406_s19 }
  0x3e   : > { %s312_s22 = sshll.u32 %s188_s20, 4  ;;  %s298_s29 = scalar_lea.sflag [#allocation4], %s700_s9  ;;  %s721_s22 = int_to_ptr.vmem [resolvable:$true] %s312_s22 }
  0x3f   : > { %s500_s30 = scalar_lea.vmem %s721_s22, 128  ;;  %p774_p11 = scmp.ne.s32.totalorder %s770_s24, 0 }
  0x40   : > { %254 = vmatpush1.bf16.msra.mxu0 %v463_v4  ;;  %p501_p6 = scmp.ne.s32.totalorder %s721_s22, %s500_s30  ;;  %s573_s16 = smov [#allocation5]  }
  0x41   : > { %255 = vmatprep.subr.bf16.mxu0 %v464_v5  ;;  %s504_s5 = sshll.u32 %s573_s16, 4  ;;  %s505_s5 = int_to_ptr.vmem [resolvable:$false] %s504_s5 }
  0x42   : > { %p502_p12 = pnand %p501_p6, %p774_p11  ;;  %s506_s10 = scalar_lea.vmem %s505_s5, 256 }
  0x43   : > { %p507_p4 = scmp.lt.s32.totalorder %s721_s22, %s505_s5  ;;  %p508_p10 = scmp.lt.s32.totalorder %s506_s10, %s500_s30 }
  0x44   : > { %256 = vmatpush1.bf16.msra.mxu0 %v466_v7  ;;  %p503_p13 = pneg %p502_p12 }
  0x45   : > { %257 = vmatprep.subr.bf16.mxu0 %v467_v8  ;;  %p509_p1 = por %p508_p10, %p507_p4 }
  0x47   : > { %p510_p3 = pnand %p509_p1, %p503_p13 }
  0x48   : > { %258 = vmatpush1.bf16.msra.mxu0 %v469_v9 }
  0x4b   : > { %399 = vmatmul.mubr.msk.bf16.vlgmr.msra.gmra.mrb[0].mxu0 %vm247_vm0, %v192_v10 }
  0xbb   : > { %v205_v11 = vpop.permute.xlu0 %204 }
 0x11e   : > { %v285_v12 = vpop.f32.mrb[0].mxu0 }
 0x11f   : > { %v286_v13 = vadd.f32 %v285_v12, %v205_v11  ;;  %v287_v14 = vpop.f32.mrb[1].mxu0 }
 0x120   : > { %v288_v15 = vadd.f32 %v287_v14, %v205_v11  ;;  %v289_v16 = vpop.f32.mrb[2].mxu0 }
 0x121   : > { %v290_v17 = vpop.f32.mrb[3].mxu0 }
 0x122   : > { %v294_v18 = vcombine.low %v286_v13, %v288_v15 }
 0x124   : > { %296 = vst [vmem:[%s188_s20] sm:$0xff] %v294_v18 }
 0x125   : > { %513 = shalt.err (!%p510_p3)
}
 0x126   : > { %s514_s9 = scalar_lea.hbm %s719_s28, 128  ;;  %s518_s4 = scalar_lea.hbm %s766_s3, 256 }
 0x127   : > { %p515_p5 = scmp.ne.s32.totalorder %s719_s28, %s514_s9  ;;  %p519_p9 = scmp.lt.u32.totalorder %s719_s28, %s766_s3 }
 0x128   : > { %p520_p0 = scmp.lt.u32.totalorder %s518_s4, %s514_s9  ;;  %p522_p6 = scmp.lt.u32.totalorder %s514_s9, %s719_s28 }
 0x129   : > { %p516_p7 = pnand %p515_p5, %p774_p11 }
 0x12a   : > { %p521_p2 = por %p520_p0, %p519_p9 }
 0x12b   : > { %p517_p8 = pneg %p516_p7 }
 0x12c   : > { %p523_p12 = por %p522_p6, %p521_p2 }
 0x12e   : > { %p524_p13 = pnand %p523_p12, %p517_p8 }
 0x130   : > { %527 = shalt.err (!%p524_p13)
}
 0x131   : > { %409 = dma.vmem_to_hbm [thread:$0]  (%p774_p11), %s721_s22, 128, %s719_s28, %s298_s29  }
 0x132 PF: > { %s324_s7 = sand.u32 1, %s554_s12   ;;  %p775_p4 = scmp.ne.s32.totalorder %s771_s25, 0 }
 0x133   : > { %p776_p10 = scmp.ge.s32.totalorder %s566_s15, 2  ;;  %s325_s8 = scalar_lea.sflag [#allocation4], %s324_s7 }
 0x135   : > { %p416_p1 = pnand %p776_p10, %p775_p4 }
 0x137   : > { %549 = dma.done.wait (!%p416_p1), %s325_s8, 128  }
 0x138   : > { %551 = vsyncadd (!%p416_p1), %s325_s8, 4294967168  ;;  %p16_p3 = scmp.ge.s32.totalorder %s619_s18, 4   ;;  %s777_s12 = smov %s558_s13 }
 0x139   : > { %s778_s13 = smov %s562_s14  ;;  %s779_s14 = smov %s631_s21 }
 0x13a   : > { %s780_s15 = smov %s619_s18  ;;  %18 = sbr.rel (!%p16_p3) target bundleno = 5 (0x5), region = 77 }
 0x141   :  { %330 = vsyncpa [#allocation3], 1 }
 0x142   :  { %332 = vsyncpa [#allocation3 + $0x1], 1 }
 0x143   :  { %333 = vsyncpa [#allocation4], 1 }
 0x144   :  { %335 = vsyncpa [#allocation4 + $0x1], 1 }

</bundles_post_ra>
